<compile_context>
chip_gen: v7x
topology: tpu7x:2x2x1
jax: 0.10.0
libtpu: 0.0.40
codegen_flags: <defaults>
</compile_context>

<pallas_src>
import functools
import math

import jax
import jax.numpy as jnp
from jax import lax
from jax.experimental import pallas as pl
from jax.experimental.pallas import tpu as pltpu


def precompute_rope_params(head_dim, theta_base=10000.0, context_length=4096):
    assert head_dim % 2 == 0
    inv_freq = 1.0 / theta_base ** (
        jnp.arange(0, head_dim, 2)[: head_dim // 2].astype(jnp.float32) / head_dim
    )
    positions = jnp.arange(context_length).astype(jnp.float32)
    angles = positions[:, None] * inv_freq[None, :]
    angles = jnp.concatenate([angles, angles], axis=1)
    return jnp.cos(angles), jnp.sin(angles)


# --------------- Kernel 1: fused QKV projection + per-head RoPE -----------------------
def _qkv_rope_kernel(x_ref, wqkv_ref, cos_ref, sin_ref, q_ref, k_ref, v_ref,
                     *, num_heads, head_dim, d_out, scale):
    x = x_ref[0].astype(jnp.bfloat16)                 # (TT, d_in) bf16
    qkv = jnp.dot(x, wqkv_ref[...],                   # single fused GEMM, f32 accumulate
                  preferred_element_type=jnp.float32)  # (TT, 3*d_out)

    cos = cos_ref[...]                                # (TT, head_dim) f32
    sin = sin_ref[...]
    half = head_dim // 2

    def rope(t):                                      # (TT, head_dim) f32
        t1 = t[:, :half]
        t2 = t[:, half:]
        rotated = jnp.concatenate([-t2, t1], axis=-1)
        return t * cos + rotated * sin

    # Static unroll over heads (heads are also a grid axis in the attention kernel,
    # so live ranges here are only (TT, head_dim) slabs).
    for h in range(num_heads):
        qh = qkv[:, h * head_dim:(h + 1) * head_dim]
        kh = qkv[:, d_out + h * head_dim:d_out + (h + 1) * head_dim]
        vh = qkv[:, 2 * d_out + h * head_dim:2 * d_out + (h + 1) * head_dim]
        # fold 1/sqrt(head_dim) into q once here (cheaper than scaling (T,T) scores)
        q_ref[0, h] = (rope(qh) * scale).astype(jnp.bfloat16)
        k_ref[0, h] = rope(kh).astype(jnp.bfloat16)
        v_ref[0, h] = vh.astype(jnp.bfloat16)


# --------------- Kernel 2: flash attention + per-head output projection ---------------
def _flash_attn_kernel(q_ref, k_ref, v_ref, wo_ref, o_ref,
                       m_scr, l_scr, ctx_scr, out_scr,
                       *, tq, tk, num_heads):
    qi = pl.program_id(1)
    h = pl.program_id(2)
    ki = pl.program_id(3)

    q_end = qi * tq + (tq - 1)          # last global query row of this tile
    last_ki = q_end // tk               # last KV tile with any unmasked column (causal)
    needed = ki <= last_ki              # fully-future tiles are skipped
    is_last = ki == last_ki

    @pl.when(ki == 0)
    def _():
        m_scr[...] = jnp.full_like(m_scr, -1e30)
        l_scr[...] = jnp.zeros_like(l_scr)
        ctx_scr[...] = jnp.zeros_like(ctx_scr)

    @pl.when((h == 0) & (ki == 0))
    def _():
        out_scr[...] = jnp.zeros_like(out_scr)

    @pl.when(needed)
    def _():
        q = q_ref[0, 0]                 # (tq, hd) bf16, pre-scaled by 1/sqrt(hd)
        k = k_ref[0, 0]                 # (tk, hd) bf16
        v = v_ref[0, 0]                 # (tk, hd) bf16

        # contract last axes of q and k -> no explicit k transpose
        s = lax.dot_general(q, k, (((1,), (1,)), ((), ())),
                            preferred_element_type=jnp.float32)     # (tq, tk) f32

        row = qi * tq + lax.broadcasted_iota(jnp.int32, (tq, tk), 0)
        col = ki * tk + lax.broadcasted_iota(jnp.int32, (tq, tk), 1)
        s = jnp.where(col > row, -1e30, s)   # finite mask -> no inf-inf NaN hazard

        m_prev = m_scr[...]
        m_new = jnp.maximum(m_prev, jnp.max(s, axis=-1, keepdims=True))
        alpha = jnp.exp(m_prev - m_new)
        p = jnp.exp(s - m_new)
        l_scr[...] = alpha * l_scr[...] + jnp.sum(p, axis=-1, keepdims=True)
        ctx_scr[...] = alpha * ctx_scr[...] + jnp.dot(
            p.astype(jnp.bfloat16), v, preferred_element_type=jnp.float32)
        m_scr[...] = m_new

    @pl.when(is_last)
    def _():
        # normalize this head's context and fold it straight into the output projection
        ctx = ctx_scr[...] * pl.reciprocal(l_scr[...], approx=True)
        out_scr[...] += jnp.dot(ctx.astype(jnp.bfloat16), wo_ref[...],
                                preferred_element_type=jnp.float32)

    @pl.when(is_last & (h == num_heads - 1))
    def _():
        o_ref[0] = out_scr[...].astype(o_ref.dtype)


# --------------------------------- wrapper --------------------------------------------
def multi_head_attention(x, w_q, w_k, w_v, w_o, cos, sin, num_heads,
                         *, q_tile=128, kv_tile=128, proj_tile=256):
    B, T, d_in = x.shape
    d_out = w_q.shape[1]
    assert d_out % num_heads == 0
    head_dim = d_out // num_heads
    assert head_dim % 2 == 0

    tt = min(proj_tile, T)
    tq = min(q_tile, T)
    tk = min(kv_tile, T)
    assert T % tt == 0 and T % tq == 0 and T % tk == 0, \
        "sequence length must divide the chosen tiles"
    # TODO(synk): pad T (and mask padded keys) for sequence lengths not divisible by the tiles.

    w_qkv = jnp.concatenate([w_q, w_k, w_v], axis=1).astype(jnp.bfloat16)  # (d_in, 3*d_out)
    wo_bf16 = w_o.astype(jnp.bfloat16)
    cos_t = cos[:T, :].astype(jnp.float32)
    sin_t = sin[:T, :].astype(jnp.float32)
    scale = 1.0 / math.sqrt(head_dim)
    vmem_limit = 48 * 1024 * 1024   # explicit budget with headroom for v7x (64 MiB physical)

    # ---- Kernel 1: QKV projection + RoPE -> q,k,v in (B, H, T, head_dim) bf16 ----
    qkv_out_shape = [jax.ShapeDtypeStruct((B, num_heads, T, head_dim), jnp.bfloat16)] * 3
    qkv_out_spec = pl.BlockSpec((1, num_heads, tt, head_dim), lambda b, t: (b, 0, t, 0))
    q, k, v = pl.pallas_call(
        functools.partial(_qkv_rope_kernel, num_heads=num_heads, head_dim=head_dim,
                          d_out=d_out, scale=scale),
        out_shape=qkv_out_shape,
        grid=(B, T // tt),
        in_specs=[
            pl.BlockSpec((1, tt, d_in), lambda b, t: (b, t, 0)),
            pl.BlockSpec((d_in, 3 * d_out), lambda b, t: (0, 0)),
            pl.BlockSpec((tt, head_dim), lambda b, t: (t, 0)),
            pl.BlockSpec((tt, head_dim), lambda b, t: (t, 0)),
        ],
        out_specs=[qkv_out_spec, qkv_out_spec, qkv_out_spec],
        compiler_params=pltpu.CompilerParams(
            dimension_semantics=("parallel", "parallel"),
            vmem_limit_bytes=vmem_limit),
        cost_estimate=pl.CostEstimate(
            flops=2 * B * T * d_in * 3 * d_out,
            transcendentals=0,
            bytes_accessed=(B * T * d_in * 4 + d_in * 3 * d_out * 2
                            + 3 * B * num_heads * T * head_dim * 2)),
    )(x, w_qkv, cos_t, sin_t)

    # ---- Kernel 2: flash attention + per-head output projection -> (B, T, d_out) ----
    n_q = T // tq
    n_k = T // tk
    out = pl.pallas_call(
        functools.partial(_flash_attn_kernel, tq=tq, tk=tk, num_heads=num_heads),
        out_shape=jax.ShapeDtypeStruct((B, T, d_out), x.dtype),
        grid=(B, n_q, num_heads, n_k),
        in_specs=[
            pl.BlockSpec((1, 1, tq, head_dim), lambda b, qi, h, ki: (b, h, qi, 0)),
            pl.BlockSpec((1, 1, tk, head_dim), lambda b, qi, h, ki: (b, h, ki, 0)),
            pl.BlockSpec((1, 1, tk, head_dim), lambda b, qi, h, ki: (b, h, ki, 0)),
            pl.BlockSpec((head_dim, d_out), lambda b, qi, h, ki: (h, 0)),
        ],
        out_specs=pl.BlockSpec((1, tq, d_out), lambda b, qi, h, ki: (b, qi, 0)),
        scratch_shapes=[
            pltpu.VMEM((tq, 1), jnp.float32),         # running max
            pltpu.VMEM((tq, 1), jnp.float32),         # running sum
            pltpu.VMEM((tq, head_dim), jnp.float32),  # per-head ctx accumulator
            pltpu.VMEM((tq, d_out), jnp.float32),     # output-projection accumulator
        ],
        compiler_params=pltpu.CompilerParams(
            dimension_semantics=("parallel", "parallel", "arbitrary", "arbitrary"),
            vmem_limit_bytes=vmem_limit),
        cost_estimate=pl.CostEstimate(
            flops=4 * B * num_heads * T * T * head_dim + 2 * B * T * d_out * d_out,
            transcendentals=B * num_heads * T * T,
            bytes_accessed=(3 * B * num_heads * T * head_dim * 2
                            + d_out * d_out * 2 + B * T * d_out * 4)),
    )(q, k, v, wo_bf16)
    return out


# ---------------- plain-JAX reference (mirrors the PyTorch forward) ----------------
def _reference(x, w_q, w_k, w_v, w_o, cos, sin, num_heads):
    B, T, d_in = x.shape
    d_out = w_q.shape[1]
    hd = d_out // num_heads

    def proj(w):
        y = x @ w
        return y.reshape(B, T, num_heads, hd).transpose(0, 2, 1, 3)

    def rope(t):
        c = cos[:T][None, None]
        s = sin[:T][None, None]
        t1, t2 = t[..., : hd // 2], t[..., hd // 2:]
        rot = jnp.concatenate([-t2, t1], axis=-1)
        return t * c + rot * s

    q = rope(proj(w_q))
    k = rope(proj(w_k))
    v = proj(w_v)

    scores = jnp.einsum("bhqd,bhkd->bhqk", q, k)
    mask = jnp.triu(jnp.ones((T, T), dtype=bool), k=1)
    scores = jnp.where(mask[None, None], -jnp.inf, scores)
    w = jax.nn.softmax(scores / math.sqrt(hd), axis=-1)
    ctx = jnp.einsum("bhqk,bhkd->bhqd", w, v).transpose(0, 2, 1, 3).reshape(B, T, d_out)
    return ctx @ w_o


if __name__ == "__main__":
    B, T, d_in, d_out, num_heads = 2, 8, 32, 32, 4
    context_length = 16
    head_dim = d_out // num_heads

    key = jax.random.PRNGKey(0)
    kx, kq, kk, kv, ko = jax.random.split(key, 5)
    x = jax.random.normal(kx, (B, T, d_in), dtype=jnp.float32)
    w_q = jax.random.normal(kq, (d_in, d_out), dtype=jnp.float32) * 0.1
    w_k = jax.random.normal(kk, (d_in, d_out), dtype=jnp.float32) * 0.1
    w_v = jax.random.normal(kv, (d_in, d_out), dtype=jnp.float32) * 0.1
    w_o = jax.random.normal(ko, (d_out, d_out), dtype=jnp.float32) * 0.1

    cos, sin = precompute_rope_params(head_dim, context_length=context_length)

    out = multi_head_attention(x, w_q, w_k, w_v, w_o, cos, sin, num_heads)
    out = jax.block_until_ready(out)

    ref = _reference(x, w_q, w_k, w_v, w_o, cos, sin, num_heads)
    assert out.shape == (B, T, d_out)
    err = float(jnp.max(jnp.abs(out - ref)))
    # bf16 MXU operands + approx reciprocal -> compare with a loosened tolerance
    assert err < 5e-2, f"mismatch vs reference: max abs err {err}"

    print("KERNEL_OK")
</pallas_src>

<mosaic_0001>
module attributes {stable_mosaic.version = 11 : i64} {
  func.func @_qkv_rope_kernel(%arg0: i32, %arg1: i32, %arg2: memref<1x8x32xf32, #tpu.memory_space<vmem>>, %arg3: memref<32x96xbf16, #tpu.memory_space<vmem>>, %arg4: memref<8x8xf32, #tpu.memory_space<vmem>>, %arg5: memref<8x8xf32, #tpu.memory_space<vmem>>, %arg6: memref<1x4x8x8xbf16, #tpu.memory_space<vmem>>, %arg7: memref<1x4x8x8xbf16, #tpu.memory_space<vmem>>, %arg8: memref<1x4x8x8xbf16, #tpu.memory_space<vmem>>) attributes {dimension_semantics = [#tpu.dimension_semantics<parallel>, #tpu.dimension_semantics<parallel>], iteration_bounds = array<i64: 2, 1>, scalar_prefetch = 0 : i64, scratch_operands = 0 : i64, tpu.core_type = #tpu.core_type<tc>, window_params = [{transform_indices = @transform_0, window_bounds = array<i64: 1, 8, 32>}, {pipeline_mode = #tpu.pipeline_mode<synchronous>, transform_indices = @transform_1, window_bounds = array<i64: 32, 96>}, {transform_indices = @transform_2, window_bounds = array<i64: 8, 8>}, {transform_indices = @transform_3, window_bounds = array<i64: 8, 8>}, {transform_indices = @transform_4, window_bounds = array<i64: 1, 4, 8, 8>}, {transform_indices = @transform_5, window_bounds = array<i64: 1, 4, 8, 8>}, {transform_indices = @transform_6, window_bounds = array<i64: 1, 4, 8, 8>}]} {
    %c0 = arith.constant 0 : index
    %c0_0 = arith.constant 0 : index
    %c0_1 = arith.constant 0 : index
    %0 = vector.load %arg2[%c0, %c0_0, %c0_1] : memref<1x8x32xf32, #tpu.memory_space<vmem>>, vector<1x8x32xf32>
    %1 = vector.shape_cast %0 : vector<1x8x32xf32> to vector<8x32xf32>
    %2 = arith.truncf %1 : vector<8x32xf32> to vector<8x32xbf16>
    %c0_2 = arith.constant 0 : index
    %c0_3 = arith.constant 0 : index
    %3 = vector.load %arg3[%c0_2, %c0_3] : memref<32x96xbf16, #tpu.memory_space<vmem>>, vector<32x96xbf16>
    %cst = arith.constant dense<0.000000e+00> : vector<8x96xf32>
    %4 = tpu.matmul %2, %3, %cst {dimension_numbers = #tpu.dot_dimension_numbers<[1], [0], [0], [1], [0, 0, 1, 1], [], []>} : vector<8x32xbf16>, vector<32x96xbf16>, vector<8x96xf32> -> vector<8x96xf32>
    %c0_4 = arith.constant 0 : index
    %c0_5 = arith.constant 0 : index
    %5 = vector.load %arg4[%c0_4, %c0_5] : memref<8x8xf32, #tpu.memory_space<vmem>>, vector<8x8xf32>
    %c0_6 = arith.constant 0 : index
    %c0_7 = arith.constant 0 : index
    %6 = vector.load %arg5[%c0_6, %c0_7] : memref<8x8xf32, #tpu.memory_space<vmem>>, vector<8x8xf32>
    %7 = vector.extract_strided_slice %4 {offsets = [0, 0], sizes = [8, 8], strides = [1, 1]} : vector<8x96xf32> to vector<8x8xf32>
    %8 = vector.extract_strided_slice %4 {offsets = [0, 32], sizes = [8, 8], strides = [1, 1]} : vector<8x96xf32> to vector<8x8xf32>
    %9 = vector.extract_strided_slice %4 {offsets = [0, 64], sizes = [8, 8], strides = [1, 1]} : vector<8x96xf32> to vector<8x8xf32>
    %10 = vector.extract_strided_slice %7 {offsets = [0, 0], sizes = [8, 4], strides = [1, 1]} : vector<8x8xf32> to vector<8x4xf32>
    %11 = vector.extract_strided_slice %7 {offsets = [0, 4], sizes = [8, 4], strides = [1, 1]} : vector<8x8xf32> to vector<8x4xf32>
    %cst_8 = arith.constant 0.000000e+00 : f32
    %12 = vector.broadcast %cst_8 : f32 to vector<8x4xf32>
    %13 = arith.subf %12, %11 : vector<8x4xf32>
    %14 = tpu.concatenate %13, %10 in 1 : vector<8x4xf32>, vector<8x4xf32> -> vector<8x8xf32>
    %15 = arith.mulf %7, %5 : vector<8x8xf32>
    %16 = arith.mulf %14, %6 : vector<8x8xf32>
    %17 = arith.addf %15, %16 : vector<8x8xf32>
    %cst_9 = arith.constant 0.353553385 : f32
    %18 = vector.broadcast %cst_9 : f32 to vector<8x8xf32>
    %19 = arith.mulf %17, %18 : vector<8x8xf32>
    %20 = arith.truncf %19 : vector<8x8xf32> to vector<8x8xbf16>
    %c0_10 = arith.constant 0 : index
    %c0_11 = arith.constant 0 : index
    %c0_12 = arith.constant 0 : index
    %c0_13 = arith.constant 0 : index
    %21 = vector.load %arg6[%c0_10, %c0_11, %c0_12, %c0_13] : memref<1x4x8x8xbf16, #tpu.memory_space<vmem>>, vector<1x1x8x8xbf16>
    %22 = vector.shape_cast %21 : vector<1x1x8x8xbf16> to vector<8x8xbf16>
    %23 = vector.shape_cast %20 : vector<8x8xbf16> to vector<1x1x8x8xbf16>
    tpu.vector_store %arg6[%c0_10, %c0_11, %c0_12, %c0_13], %23 {strides = array<i32>} : memref<1x4x8x8xbf16, #tpu.memory_space<vmem>>, vector<1x1x8x8xbf16>,
    %24 = vector.extract_strided_slice %8 {offsets = [0, 0], sizes = [8, 4], strides = [1, 1]} : vector<8x8xf32> to vector<8x4xf32>
    %25 = vector.extract_strided_slice %8 {offsets = [0, 4], sizes = [8, 4], strides = [1, 1]} : vector<8x8xf32> to vector<8x4xf32>
    %cst_14 = arith.constant 0.000000e+00 : f32
    %26 = vector.broadcast %cst_14 : f32 to vector<8x4xf32>
    %27 = arith.subf %26, %25 : vector<8x4xf32>
    %28 = tpu.concatenate %27, %24 in 1 : vector<8x4xf32>, vector<8x4xf32> -> vector<8x8xf32>
    %29 = arith.mulf %8, %5 : vector<8x8xf32>
    %30 = arith.mulf %28, %6 : vector<8x8xf32>
    %31 = arith.addf %29, %30 : vector<8x8xf32>
    %32 = arith.truncf %31 : vector<8x8xf32> to vector<8x8xbf16>
    %c0_15 = arith.constant 0 : index
    %c0_16 = arith.constant 0 : index
    %c0_17 = arith.constant 0 : index
    %c0_18 = arith.constant 0 : index
    %33 = vector.load %arg7[%c0_15, %c0_16, %c0_17, %c0_18] : memref<1x4x8x8xbf16, #tpu.memory_space<vmem>>, vector<1x1x8x8xbf16>
    %34 = vector.shape_cast %33 : vector<1x1x8x8xbf16> to vector<8x8xbf16>
    %35 = vector.shape_cast %32 : vector<8x8xbf16> to vector<1x1x8x8xbf16>
    tpu.vector_store %arg7[%c0_15, %c0_16, %c0_17, %c0_18], %35 {strides = array<i32>} : memref<1x4x8x8xbf16, #tpu.memory_space<vmem>>, vector<1x1x8x8xbf16>,
    %36 = arith.truncf %9 : vector<8x8xf32> to vector<8x8xbf16>
    %c0_19 = arith.constant 0 : index
    %c0_20 = arith.constant 0 : index
    %c0_21 = arith.constant 0 : index
    %c0_22 = arith.constant 0 : index
    %37 = vector.load %arg8[%c0_19, %c0_20, %c0_21, %c0_22] : memref<1x4x8x8xbf16, #tpu.memory_space<vmem>>, vector<1x1x8x8xbf16>
    %38 = vector.shape_cast %37 : vector<1x1x8x8xbf16> to vector<8x8xbf16>
    %39 = vector.shape_cast %36 : vector<8x8xbf16> to vector<1x1x8x8xbf16>
    tpu.vector_store %arg8[%c0_19, %c0_20, %c0_21, %c0_22], %39 {strides = array<i32>} : memref<1x4x8x8xbf16, #tpu.memory_space<vmem>>, vector<1x1x8x8xbf16>,
    %40 = vector.extract_strided_slice %4 {offsets = [0, 8], sizes = [8, 8], strides = [1, 1]} : vector<8x96xf32> to vector<8x8xf32>
    %41 = vector.extract_strided_slice %4 {offsets = [0, 40], sizes = [8, 8], strides = [1, 1]} : vector<8x96xf32> to vector<8x8xf32>
    %42 = vector.extract_strided_slice %4 {offsets = [0, 72], sizes = [8, 8], strides = [1, 1]} : vector<8x96xf32> to vector<8x8xf32>
    %43 = vector.extract_strided_slice %40 {offsets = [0, 0], sizes = [8, 4], strides = [1, 1]} : vector<8x8xf32> to vector<8x4xf32>
    %44 = vector.extract_strided_slice %40 {offsets = [0, 4], sizes = [8, 4], strides = [1, 1]} : vector<8x8xf32> to vector<8x4xf32>
    %cst_23 = arith.constant 0.000000e+00 : f32
    %45 = vector.broadcast %cst_23 : f32 to vector<8x4xf32>
    %46 = arith.subf %45, %44 : vector<8x4xf32>
    %47 = tpu.concatenate %46, %43 in 1 : vector<8x4xf32>, vector<8x4xf32> -> vector<8x8xf32>
    %48 = arith.mulf %40, %5 : vector<8x8xf32>
    %49 = arith.mulf %47, %6 : vector<8x8xf32>
    %50 = arith.addf %48, %49 : vector<8x8xf32>
    %cst_24 = arith.constant 0.353553385 : f32
    %51 = vector.broadcast %cst_24 : f32 to vector<8x8xf32>
    %52 = arith.mulf %50, %51 : vector<8x8xf32>
    %53 = arith.truncf %52 : vector<8x8xf32> to vector<8x8xbf16>
    %c0_25 = arith.constant 0 : index
    %c1 = arith.constant 1 : index
    %c0_26 = arith.constant 0 : index
    %c0_27 = arith.constant 0 : index
    %54 = vector.load %arg6[%c0_25, %c1, %c0_26, %c0_27] : memref<1x4x8x8xbf16, #tpu.memory_space<vmem>>, vector<1x1x8x8xbf16>
    %55 = vector.shape_cast %54 : vector<1x1x8x8xbf16> to vector<8x8xbf16>
    %56 = vector.shape_cast %53 : vector<8x8xbf16> to vector<1x1x8x8xbf16>
    tpu.vector_store %arg6[%c0_25, %c1, %c0_26, %c0_27], %56 {strides = array<i32>} : memref<1x4x8x8xbf16, #tpu.memory_space<vmem>>, vector<1x1x8x8xbf16>,
    %57 = vector.extract_strided_slice %41 {offsets = [0, 0], sizes = [8, 4], strides = [1, 1]} : vector<8x8xf32> to vector<8x4xf32>
    %58 = vector.extract_strided_slice %41 {offsets = [0, 4], sizes = [8, 4], strides = [1, 1]} : vector<8x8xf32> to vector<8x4xf32>
    %cst_28 = arith.constant 0.000000e+00 : f32
    %59 = vector.broadcast %cst_28 : f32 to vector<8x4xf32>
    %60 = arith.subf %59, %58 : vector<8x4xf32>
    %61 = tpu.concatenate %60, %57 in 1 : vector<8x4xf32>, vector<8x4xf32> -> vector<8x8xf32>
    %62 = arith.mulf %41, %5 : vector<8x8xf32>
    %63 = arith.mulf %61, %6 : vector<8x8xf32>
    %64 = arith.addf %62, %63 : vector<8x8xf32>
    %65 = arith.truncf %64 : vector<8x8xf32> to vector<8x8xbf16>
    %c0_29 = arith.constant 0 : index
    %c1_30 = arith.constant 1 : index
    %c0_31 = arith.constant 0 : index
    %c0_32 = arith.constant 0 : index
    %66 = vector.load %arg7[%c0_29, %c1_30, %c0_31, %c0_32] : memref<1x4x8x8xbf16, #tpu.memory_space<vmem>>, vector<1x1x8x8xbf16>
    %67 = vector.shape_cast %66 : vector<1x1x8x8xbf16> to vector<8x8xbf16>
    %68 = vector.shape_cast %65 : vector<8x8xbf16> to vector<1x1x8x8xbf16>
    tpu.vector_store %arg7[%c0_29, %c1_30, %c0_31, %c0_32], %68 {strides = array<i32>} : memref<1x4x8x8xbf16, #tpu.memory_space<vmem>>, vector<1x1x8x8xbf16>,
    %69 = arith.truncf %42 : vector<8x8xf32> to vector<8x8xbf16>
    %c0_33 = arith.constant 0 : index
    %c1_34 = arith.constant 1 : index
    %c0_35 = arith.constant 0 : index
    %c0_36 = arith.constant 0 : index
    %70 = vector.load %arg8[%c0_33, %c1_34, %c0_35, %c0_36] : memref<1x4x8x8xbf16, #tpu.memory_space<vmem>>, vector<1x1x8x8xbf16>
    %71 = vector.shape_cast %70 : vector<1x1x8x8xbf16> to vector<8x8xbf16>
    %72 = vector.shape_cast %69 : vector<8x8xbf16> to vector<1x1x8x8xbf16>
    tpu.vector_store %arg8[%c0_33, %c1_34, %c0_35, %c0_36], %72 {strides = array<i32>} : memref<1x4x8x8xbf16, #tpu.memory_space<vmem>>, vector<1x1x8x8xbf16>,
    %73 = vector.extract_strided_slice %4 {offsets = [0, 16], sizes = [8, 8], strides = [1, 1]} : vector<8x96xf32> to vector<8x8xf32>
    %74 = vector.extract_strided_slice %4 {offsets = [0, 48], sizes = [8, 8], strides = [1, 1]} : vector<8x96xf32> to vector<8x8xf32>
    %75 = vector.extract_strided_slice %4 {offsets = [0, 80], sizes = [8, 8], strides = [1, 1]} : vector<8x96xf32> to vector<8x8xf32>
    %76 = vector.extract_strided_slice %73 {offsets = [0, 0], sizes = [8, 4], strides = [1, 1]} : vector<8x8xf32> to vector<8x4xf32>
    %77 = vector.extract_strided_slice %73 {offsets = [0, 4], sizes = [8, 4], strides = [1, 1]} : vector<8x8xf32> to vector<8x4xf32>
    %cst_37 = arith.constant 0.000000e+00 : f32
    %78 = vector.broadcast %cst_37 : f32 to vector<8x4xf32>
    %79 = arith.subf %78, %77 : vector<8x4xf32>
    %80 = tpu.concatenate %79, %76 in 1 : vector<8x4xf32>, vector<8x4xf32> -> vector<8x8xf32>
    %81 = arith.mulf %73, %5 : vector<8x8xf32>
    %82 = arith.mulf %80, %6 : vector<8x8xf32>
    %83 = arith.addf %81, %82 : vector<8x8xf32>
    %cst_38 = arith.constant 0.353553385 : f32
    %84 = vector.broadcast %cst_38 : f32 to vector<8x8xf32>
    %85 = arith.mulf %83, %84 : vector<8x8xf32>
    %86 = arith.truncf %85 : vector<8x8xf32> to vector<8x8xbf16>
    %c0_39 = arith.constant 0 : index
    %c2 = arith.constant 2 : index
    %c0_40 = arith.constant 0 : index
    %c0_41 = arith.constant 0 : index
    %87 = vector.load %arg6[%c0_39, %c2, %c0_40, %c0_41] : memref<1x4x8x8xbf16, #tpu.memory_space<vmem>>, vector<1x1x8x8xbf16>
    %88 = vector.shape_cast %87 : vector<1x1x8x8xbf16> to vector<8x8xbf16>
    %89 = vector.shape_cast %86 : vector<8x8xbf16> to vector<1x1x8x8xbf16>
    tpu.vector_store %arg6[%c0_39, %c2, %c0_40, %c0_41], %89 {strides = array<i32>} : memref<1x4x8x8xbf16, #tpu.memory_space<vmem>>, vector<1x1x8x8xbf16>,
    %90 = vector.extract_strided_slice %74 {offsets = [0, 0], sizes = [8, 4], strides = [1, 1]} : vector<8x8xf32> to vector<8x4xf32>
    %91 = vector.extract_strided_slice %74 {offsets = [0, 4], sizes = [8, 4], strides = [1, 1]} : vector<8x8xf32> to vector<8x4xf32>
    %cst_42 = arith.constant 0.000000e+00 : f32
    %92 = vector.broadcast %cst_42 : f32 to vector<8x4xf32>
    %93 = arith.subf %92, %91 : vector<8x4xf32>
    %94 = tpu.concatenate %93, %90 in 1 : vector<8x4xf32>, vector<8x4xf32> -> vector<8x8xf32>
    %95 = arith.mulf %74, %5 : vector<8x8xf32>
    %96 = arith.mulf %94, %6 : vector<8x8xf32>
    %97 = arith.addf %95, %96 : vector<8x8xf32>
    %98 = arith.truncf %97 : vector<8x8xf32> to vector<8x8xbf16>
    %c0_43 = arith.constant 0 : index
    %c2_44 = arith.constant 2 : index
    %c0_45 = arith.constant 0 : index
    %c0_46 = arith.constant 0 : index
    %99 = vector.load %arg7[%c0_43, %c2_44, %c0_45, %c0_46] : memref<1x4x8x8xbf16, #tpu.memory_space<vmem>>, vector<1x1x8x8xbf16>
    %100 = vector.shape_cast %99 : vector<1x1x8x8xbf16> to vector<8x8xbf16>
    %101 = vector.shape_cast %98 : vector<8x8xbf16> to vector<1x1x8x8xbf16>
    tpu.vector_store %arg7[%c0_43, %c2_44, %c0_45, %c0_46], %101 {strides = array<i32>} : memref<1x4x8x8xbf16, #tpu.memory_space<vmem>>, vector<1x1x8x8xbf16>,
    %102 = arith.truncf %75 : vector<8x8xf32> to vector<8x8xbf16>
    %c0_47 = arith.constant 0 : index
    %c2_48 = arith.constant 2 : index
    %c0_49 = arith.constant 0 : index
    %c0_50 = arith.constant 0 : index
    %103 = vector.load %arg8[%c0_47, %c2_48, %c0_49, %c0_50] : memref<1x4x8x8xbf16, #tpu.memory_space<vmem>>, vector<1x1x8x8xbf16>
    %104 = vector.shape_cast %103 : vector<1x1x8x8xbf16> to vector<8x8xbf16>
    %105 = vector.shape_cast %102 : vector<8x8xbf16> to vector<1x1x8x8xbf16>
    tpu.vector_store %arg8[%c0_47, %c2_48, %c0_49, %c0_50], %105 {strides = array<i32>} : memref<1x4x8x8xbf16, #tpu.memory_space<vmem>>, vector<1x1x8x8xbf16>,
    %106 = vector.extract_strided_slice %4 {offsets = [0, 24], sizes = [8, 8], strides = [1, 1]} : vector<8x96xf32> to vector<8x8xf32>
    %107 = vector.extract_strided_slice %4 {offsets = [0, 56], sizes = [8, 8], strides = [1, 1]} : vector<8x96xf32> to vector<8x8xf32>
    %108 = vector.extract_strided_slice %4 {offsets = [0, 88], sizes = [8, 8], strides = [1, 1]} : vector<8x96xf32> to vector<8x8xf32>
    %109 = vector.extract_strided_slice %106 {offsets = [0, 0], sizes = [8, 4], strides = [1, 1]} : vector<8x8xf32> to vector<8x4xf32>
    %110 = vector.extract_strided_slice %106 {offsets = [0, 4], sizes = [8, 4], strides = [1, 1]} : vector<8x8xf32> to vector<8x4xf32>
    %cst_51 = arith.constant 0.000000e+00 : f32
    %111 = vector.broadcast %cst_51 : f32 to vector<8x4xf32>
    %112 = arith.subf %111, %110 : vector<8x4xf32>
    %113 = tpu.concatenate %112, %109 in 1 : vector<8x4xf32>, vector<8x4xf32> -> vector<8x8xf32>
    %114 = arith.mulf %106, %5 : vector<8x8xf32>
    %115 = arith.mulf %113, %6 : vector<8x8xf32>
    %116 = arith.addf %114, %115 : vector<8x8xf32>
    %cst_52 = arith.constant 0.353553385 : f32
    %117 = vector.broadcast %cst_52 : f32 to vector<8x8xf32>
    %118 = arith.mulf %116, %117 : vector<8x8xf32>
    %119 = arith.truncf %118 : vector<8x8xf32> to vector<8x8xbf16>
    %c0_53 = arith.constant 0 : index
    %c3 = arith.constant 3 : index
    %c0_54 = arith.constant 0 : index
    %c0_55 = arith.constant 0 : index
    %120 = vector.load %arg6[%c0_53, %c3, %c0_54, %c0_55] : memref<1x4x8x8xbf16, #tpu.memory_space<vmem>>, vector<1x1x8x8xbf16>
    %121 = vector.shape_cast %120 : vector<1x1x8x8xbf16> to vector<8x8xbf16>
    %122 = vector.shape_cast %119 : vector<8x8xbf16> to vector<1x1x8x8xbf16>
    tpu.vector_store %arg6[%c0_53, %c3, %c0_54, %c0_55], %122 {strides = array<i32>} : memref<1x4x8x8xbf16, #tpu.memory_space<vmem>>, vector<1x1x8x8xbf16>,
    %123 = vector.extract_strided_slice %107 {offsets = [0, 0], sizes = [8, 4], strides = [1, 1]} : vector<8x8xf32> to vector<8x4xf32>
    %124 = vector.extract_strided_slice %107 {offsets = [0, 4], sizes = [8, 4], strides = [1, 1]} : vector<8x8xf32> to vector<8x4xf32>
    %cst_56 = arith.constant 0.000000e+00 : f32
    %125 = vector.broadcast %cst_56 : f32 to vector<8x4xf32>
    %126 = arith.subf %125, %124 : vector<8x4xf32>
    %127 = tpu.concatenate %126, %123 in 1 : vector<8x4xf32>, vector<8x4xf32> -> vector<8x8xf32>
    %128 = arith.mulf %107, %5 : vector<8x8xf32>
    %129 = arith.mulf %127, %6 : vector<8x8xf32>
    %130 = arith.addf %128, %129 : vector<8x8xf32>
    %131 = arith.truncf %130 : vector<8x8xf32> to vector<8x8xbf16>
    %c0_57 = arith.constant 0 : index
    %c3_58 = arith.constant 3 : index
    %c0_59 = arith.constant 0 : index
    %c0_60 = arith.constant 0 : index
    %132 = vector.load %arg7[%c0_57, %c3_58, %c0_59, %c0_60] : memref<1x4x8x8xbf16, #tpu.memory_space<vmem>>, vector<1x1x8x8xbf16>
    %133 = vector.shape_cast %132 : vector<1x1x8x8xbf16> to vector<8x8xbf16>
    %134 = vector.shape_cast %131 : vector<8x8xbf16> to vector<1x1x8x8xbf16>
    tpu.vector_store %arg7[%c0_57, %c3_58, %c0_59, %c0_60], %134 {strides = array<i32>} : memref<1x4x8x8xbf16, #tpu.memory_space<vmem>>, vector<1x1x8x8xbf16>,
    %135 = arith.truncf %108 : vector<8x8xf32> to vector<8x8xbf16>
    %c0_61 = arith.constant 0 : index
    %c3_62 = arith.constant 3 : index
    %c0_63 = arith.constant 0 : index
    %c0_64 = arith.constant 0 : index
    %136 = vector.load %arg8[%c0_61, %c3_62, %c0_63, %c0_64] : memref<1x4x8x8xbf16, #tpu.memory_space<vmem>>, vector<1x1x8x8xbf16>
    %137 = vector.shape_cast %136 : vector<1x1x8x8xbf16> to vector<8x8xbf16>
    %138 = vector.shape_cast %135 : vector<8x8xbf16> to vector<1x1x8x8xbf16>
    tpu.vector_store %arg8[%c0_61, %c3_62, %c0_63, %c0_64], %138 {strides = array<i32>} : memref<1x4x8x8xbf16, #tpu.memory_space<vmem>>, vector<1x1x8x8xbf16>,
    return
  }
  func.func @transform_0(%arg0: i32, %arg1: i32) -> (i32, i32, i32) {
    %c0_i32 = arith.constant 0 : i32
    %c0_i32_0 = arith.constant 0 : i32
    return %arg0, %arg1, %c0_i32 : i32, i32, i32
  }
  func.func @transform_1(%arg0: i32, %arg1: i32) -> (i32, i32) {
    %c0_i32 = arith.constant 0 : i32
    %c0_i32_0 = arith.constant 0 : i32
    %c0_i32_1 = arith.constant 0 : i32
    return %c0_i32, %c0_i32_0 : i32, i32
  }
  func.func @transform_2(%arg0: i32, %arg1: i32) -> (i32, i32) {
    %c0_i32 = arith.constant 0 : i32
    %c0_i32_0 = arith.constant 0 : i32
    return %arg1, %c0_i32 : i32, i32
  }
  func.func @transform_3(%arg0: i32, %arg1: i32) -> (i32, i32) {
    %c0_i32 = arith.constant 0 : i32
    %c0_i32_0 = arith.constant 0 : i32
    return %arg1, %c0_i32 : i32, i32
  }
  func.func @transform_4(%arg0: i32, %arg1: i32) -> (i32, i32, i32, i32) {
    %c0_i32 = arith.constant 0 : i32
    %c0_i32_0 = arith.constant 0 : i32
    %c0_i32_1 = arith.constant 0 : i32
    return %arg0, %c0_i32, %arg1, %c0_i32_0 : i32, i32, i32, i32
  }
  func.func @transform_5(%arg0: i32, %arg1: i32) -> (i32, i32, i32, i32) {
    %c0_i32 = arith.constant 0 : i32
    %c0_i32_0 = arith.constant 0 : i32
    %c0_i32_1 = arith.constant 0 : i32
    return %arg0, %c0_i32, %arg1, %c0_i32_0 : i32, i32, i32, i32
  }
  func.func @transform_6(%arg0: i32, %arg1: i32) -> (i32, i32, i32, i32) {
    %c0_i32 = arith.constant 0 : i32
    %c0_i32_0 = arith.constant 0 : i32
    %c0_i32_1 = arith.constant 0 : i32
    return %arg0, %c0_i32, %arg1, %c0_i32_0 : i32, i32, i32, i32
  }
}

</mosaic_0001>

<bundles_post_ra>
// kernel: tpu_custom_call.1
= control target key start
LH: loop header
LB: loop body
LE: loop exit
PB: predicated region body
PF: predicated region fallthrough
CT: control target
= control target key end

     0   :  { %s1828_s0 = inlined_call_operand.hbm [shape: f32[2,8,32], index: 0, kind: input, shape index: {}]   ;;  %s1829_s1 = inlined_call_operand.hbm [shape: bf16[32,96], index: 1, kind: input, shape index: {}]   ;;  %s1830_s2 = inlined_call_operand.hbm [shape: f32[8,8], index: 2, kind: input, shape index: {}]   ;;  %s1831_s3 = inlined_call_operand.vmem [shape: f32[8,8], index: 3, kind: input, shape index: {}]   ;;  %s1832_s4 = inlined_call_operand.hbm [shape: bf16[2,4,8,8], index: 4, kind: output, shape index: {0}]   ;;  %s1833_s5 = inlined_call_operand.hbm [shape: bf16[2,4,8,8], index: 5, kind: output, shape index: {1}]   ;;  %s1834_s6 = inlined_call_operand.hbm [shape: bf16[2,4,8,8], index: 6, kind: output, shape index: {2}]  }
   0x1   :  { %1843 = sst [smem:[#allocation16_spill]] %s1828_s0 }
   0x2   :  { %1844 = sst [smem:[#allocation17_spill]] %s1829_s1 }
   0x3   :  { %12 = vsyncpa [#allocation3], 0 }
   0x4   :  { %14 = vsyncpa [#allocation3 + $0x1], 0 }
   0x5   :  { %15 = vsyncpa [#allocation6], 0 }
   0x6   :  { %16 = vsyncpa [#allocation4], 0 }
   0x7   :  { %18 = vsyncpa [#allocation4 + $0x1], 0 }
   0x8   :  { %19 = vsyncpa [#allocation10], 0 }
   0x9   :  { %21 = vsyncpa [#allocation10 + $0x1], 0  ;;  %s1387_s21 = smov 0   ;;  %s1389_s22 = smov 0  }
   0xa   :  { %s1391_s23 = smov 0   ;;  %s1393_s24 = smov 0  }
   0xb   :  { %s1395_s25 = smov 0   ;;  %s1397_s26 = smov 0  }
   0xc LB: > { %s1418_s27 = sadd.s32 4294967295, %s1316_s26   ;;  %s1836_s28 = sadd.s32 4294967294, %s1316_s26   ;;  %s1316_s26 = sphi %s1397_s26, %s27_s26   ;;  %s1312_s25 = sphi %s1395_s25, %s1869_s25   ;;  %s1308_s24 = sphi %s1393_s24, %s1868_s24   ;;  %s1304_s23 = sphi %s1391_s23, %s1867_s23   ;;  %s1300_s22 = sphi %s1389_s22, %s1866_s22   ;;  %s1296_s21 = sphi %s1387_s21, %s1865_s21  }
   0xd   : > { %p61_p0 = scmp.ne.s32.totalorder %s1300_s22, %s1296_s21  ;;  %p1835_p1 = scmp.eq.s32.totalorder %s1418_s27, 0 }
   0xe   : > { %p166_p3 = scmp.eq.s32.totalorder %s1836_s28, 1  ;;  %p894_p5 = scmp.ge.s32.totalorder %s1316_s26, 1 }
   0xf   : > { %p1429_p4 = por %p1835_p1, %p61_p0  ;;  %p229_p7 = scmp.lt.s32.totalorder %s1316_s26, 3 }
  0x10   : > { %p1434_p6 = por %p166_p3, %p61_p0  ;;  %s1318_s8 = smov [#allocation5]  }
  0x11   : > { %s1845_s29 = scalar_select %p1429_p4, 1, 0 }
  0x12   : > { %s1846_s30 = scalar_select %p1434_p6, 1, 0 }
  0x13   : > { %p1439_p8 = pnand %p894_p5, %p229_p7  ;;  %s241_s9 = sshll.u32 %s1318_s8, 4  ;;  %s1443_s9 = int_to_ptr.vmem [resolvable:$true] %s241_s9 }
  0x14   : > { %s1319_s11 = smov [#allocation7]   ;;  %s1849_s1 = sld [smem:[#allocation17_spill]] }
  0x15   : > { %p977_p9 = pneg %p1439_p8  ;;  %s257_s12 = sshll.u32 %s1319_s11, 4  ;;  %s1454_s12 = int_to_ptr.vmem [resolvable:$true] %s257_s12 }
  0x17   : > { %p1450_p11 = pnand %p977_p9, %p1835_p1 }
  0x19   : > { %p1086_p13 = pneg %p1450_p11 }
  0x1a   : > { %s1084_s15 = scalar_lea.hbm %s1849_s1, 256 }
  0x1b   : > { %p1085_p12 = scmp.ne.s32.totalorder %s1849_s1, %s1084_s15  ;;  %p1091_p5 = scmp.lt.u32.totalorder %s1084_s15, %s1849_s1 }
  0x1d   : > { %p1087_p0 = pnand %p1086_p13, %p1085_p12 }
  0x1f   : > { %p1088_p3 = pneg %p1087_p0 }
  0x21   : > { %p1093_p7 = pnand %p1091_p5, %p1088_p3 }
  0x23   : > { %1096 = shalt.err (!%p1093_p7)
}
  0x24   : > { %s1097_s20 = scalar_lea.vmem %s1443_s9, 256  ;;  %p1105_p2 = scmp.lt.s32.totalorder %s1443_s9, %s1443_s9 }
  0x25   : > { %p1098_p9 = scmp.ne.s32.totalorder %s1443_s9, %s1097_s20  ;;  %p1106_p12 = scmp.lt.s32.totalorder %s1097_s20, %s1097_s20 }
  0x27   : > { %p1100_p10 = pnand %p1098_p9, %p1086_p13  ;;  %p1107_p0 = por %p1106_p12, %p1105_p2 }
  0x29   : > { %p1101_p1 = pneg %p1100_p10 }
  0x2b   : > { %p1108_p6 = pnand %p1107_p0, %p1101_p1 }
  0x2d   : > { %1111 = shalt.err (!%p1108_p6)
}
  0x2e   : > { %s1320_s8 = smov 64   ;;  %s1321_s11 = smov 4  }
  0x2f   : > { %980 = dma.hbm_to_vmem [thread:$0]  (!%p1450_p11), %s1849_s1, 256, %s1443_s9, [#allocation6], %s1320_s8, %s1320_s8, %s1321_s11  }
  0x30   : > { %s1112_s17 = scalar_lea.hbm %s1830_s2, 128 }
  0x31   : > { %p1113_p2 = scmp.ne.s32.totalorder %s1830_s2, %s1112_s17  ;;  %p1119_p10 = scmp.lt.u32.totalorder %s1112_s17, %s1830_s2 }
  0x33   : > { %p1115_p1 = pnand %p1113_p2, %p1086_p13 }
  0x35   : > { %p1116_p6 = pneg %p1115_p1 }
  0x37   : > { %p1121_p3 = pnand %p1119_p10, %p1116_p6 }
  0x39   : > { %1124 = shalt.err (!%p1121_p3)
}
  0x3a   : > { %s1125_s9 = scalar_lea.vmem %s1454_s12, 128  ;;  %p1133_p12 = scmp.lt.s32.totalorder %s1454_s12, %s1454_s12 }
  0x3b   : > { %p1126_p5 = scmp.ne.s32.totalorder %s1454_s12, %s1125_s9  ;;  %p1134_p0 = scmp.lt.s32.totalorder %s1125_s9, %s1125_s9 }
  0x3d   : > { %p1128_p7 = pnand %p1126_p5, %p1086_p13  ;;  %p1135_p2 = por %p1134_p0, %p1133_p12 }
  0x3f   : > { %p1129_p9 = pneg %p1128_p7 }
  0x41   : > { %p1136_p1 = pnand %p1135_p2, %p1129_p9 }
  0x43   : > { %1139 = shalt.err (!%p1136_p1)
}
  0x44   : > { %983 = dma.hbm_to_vmem [thread:$0]  (!%p1450_p11), %s1830_s2, 128, %s1454_s12, [#allocation6]  }
  0x45   : > { %s39_s11 = sadd.s32 1, %s1312_s25  ;;  %s48_s13 = sadd.s32 1, %s1304_s23 }
  0x46   : > { %p41_p13 = scmp.ge.s32.totalorder %s39_s11, 2  ;;  %p55_p6 = scmp.ne.s32.totalorder %s1304_s23, %s1300_s22 }
  0x47   : > { %p56_p10 = scmp.eq.s32.totalorder %s1316_s26, 0  ;;  %p1000_p3 = scmp.lt.s32.totalorder %s1316_s26, 2 }
  0x48   : > { %s1871_s11 = smov (%p41_p13, %s39_s11), 0  ;;  %p1850_p7 = scmp.eq.s32.totalorder %s1418_s27, 1 }
  0x49   : > { %p57_p5 = por %p56_p10, %p55_p6  ;;  %s43_s14 = ssub.s32 %s1312_s25, %s1871_s11 }
  0x4a   : > { %p1518_p9 = por %p1850_p7, %p55_p6  ;;  %s275_s15 = sand.u32 1, %s1304_s23  }
  0x4b   : > { %p46_p12 = scmp.eq.s32.totalorder %s43_s14, 0  ;;  %s899_s12 = sshll.u32 %s275_s15, 3 }
  0x4c   : > { %s1851_s10 = scalar_select %p1518_p9, 1, 0 }
  0x4d   : > { %s900_s16 = sshll.u32 %s1312_s25, 7  ;;  %s1852_s0 = sld [smem:[#allocation16_spill]] }
  0x4e   : > { %s1527_s17 = scalar_select %p46_p12, %s1304_s23, %s48_s13  }
  0x4f   : > { %s279_s9 = scalar_lea.vmem [#allocation2], %s899_s12  ;;  %p1536_p11 = pnand %p1000_p3, %p57_p5 }
  0x50   : > { %s287_s28 = sshll.u32 %s279_s9, 4  ;;  %s276_s13 = scalar_lea.sflag [#allocation3], %s275_s15  ;;  %s1540_s28 = int_to_ptr.vmem [resolvable:$true] %s287_s28 }
  0x51   : > { %p1142_p2 = pneg %p1536_p11 }
  0x53   : > { %s1532_s20 = scalar_lea.hbm %s1852_s0, %s900_s16  ;;  %s1145_s18 = scalar_lea.hbm %s1852_s0, 256 }
  0x54   : > { %s1140_s14 = scalar_lea.hbm %s1532_s20, 128  ;;  %p1146_p6 = scmp.lt.u32.totalorder %s1532_s20, %s1852_s0 }
  0x55   : > { %p1141_p0 = scmp.ne.s32.totalorder %s1532_s20, %s1140_s14  ;;  %p1147_p10 = scmp.lt.u32.totalorder %s1145_s18, %s1140_s14 }
  0x56   : > { %p1149_p5 = scmp.lt.u32.totalorder %s1140_s14, %s1532_s20 }
  0x57   : > { %p1143_p1 = pnand %p1142_p2, %p1141_p0  ;;  %p1148_p3 = por %p1147_p10, %p1146_p6 }
  0x59   : > { %p1144_p13 = pneg %p1143_p1  ;;  %p1150_p7 = por %p1149_p5, %p1148_p3 }
  0x5b   : > { %p1151_p12 = pnand %p1150_p7, %p1144_p13 }
  0x5d   : > { %1154 = shalt.err (!%p1151_p12)
}
  0x5e   : > { %s1155_s15 = scalar_lea.vmem %s1540_s28, 128  ;;  %s1322_s12 = smov [#allocation2]  }
  0x5f   : > { %p1156_p0 = scmp.ne.s32.totalorder %s1540_s28, %s1155_s15  ;;  %s1160_s16 = sshll.u32 %s1322_s12, 4  ;;  %s1161_s16 = int_to_ptr.vmem [resolvable:$false] %s1160_s16 }
  0x60   : > { %s1162_s19 = scalar_lea.vmem %s1161_s16, 256  ;;  %p1163_p4 = scmp.lt.s32.totalorder %s1540_s28, %s1161_s16 }
  0x61   : > { %p1158_p1 = pnand %p1156_p0, %p1142_p2  ;;  %p1164_p6 = scmp.lt.s32.totalorder %s1162_s19, %s1155_s15 }
  0x63   : > { %p1159_p9 = pneg %p1158_p1  ;;  %p1165_p10 = por %p1164_p6, %p1163_p4 }
  0x65   : > { %p1166_p3 = pnand %p1165_p10, %p1159_p9 }
  0x67   : > { %1169 = shalt.err (!%p1166_p3)
}
  0x68   : > { %987 = dma.hbm_to_vmem [thread:$0]  (!%p1536_p11), %s1532_s20, 128, %s1540_s28, %s276_s13  }
  0x69   : > { %296 = sbr.rel (%p1439_p8) target bundleno = 779 (0x30b), region = 36  ;;  %s1570_s14 = sand.u32 (!%p1439_p8), 1, %s1300_s22  }
  0x6a   : > { %s902_s18 = sshll.u32 (!%p1439_p8), %s1570_s14, 3  ;;  %s299_s9 = scalar_lea.sflag (!%p1439_p8), [#allocation3], %s1570_s14 }
  0x6b   : > { %s302_s15 = scalar_lea.vmem (!%p1439_p8), [#allocation2], %s902_s18  ;;  %p1854_p4 = scmp.ne.s32.totalorder (!%p1439_p8), %s1845_s29, 0 }
  0x70   : > { %1279 = dma.done.wait (%p1854_p4), %s299_s9, 128  }
  0x71   : > { %1281 = vsyncadd (%p1854_p4), %s299_s9, 4294967168  ;;  %p1855_p9 = scmp.eq.s32.totalorder %s1418_s27, 0 }
  0x73   : > { %1283 = dma.done.wait (%p1855_p9), [#allocation6], 384   ;;  %p1856_p11 = pmov %p1855_p9 }
  0x74   : > { %v1323_v0 = vmov 0.0   ;;  %vm1324_vm0 = vmmov 0   ;;  %v1082_v1 = vld [vmem:[#allocation5] sm:$0xff]   ;;  %v1083_v2 = vld [vmem:[#allocation5 + $0x8] sm:$0xff]   ;;  %v358_v3 = vld [vmem:[%s302_s15] sm:$0xff]  ;;  %vm376_vm1 = vcmask 261120  }
  0x75   : > { %1285 = vsyncadd (%p1856_p11), [#allocation6], 4294966912  ;;  %953 = vmatprep.subr.bf16.mxu0 %v1323_v0  ;;  %957 = vmatprep.mubr.msk.bf16.mxu0 %vm1324_vm0, %v1323_v0  ;;  %v359_v4 = vpack.c.bf16 %v358_v3, %v358_v3  ;;  %v420_v5 = vld [vmem:[#allocation7] sm:$0xff]  ;;  %s1325_s29 = smov 116   ;;  %s1326_s7 = smov 124   ;;  %vm431_vm2 = vcmask 31744  }
  0x76   : > { %954 = vmatpush3.bf16.msra.mxu0 %v1082_v1  ;;  %s1327_s20 = smov 108   ;;  %s1328_s28 = smov 100   ;;  %v1613_v14 = vld [vmem:[%s1831_s3] sm:$0xff]  ;;  %vm438_vm3 = vcmask 60416  }
  0x77   : > { %955 = vmatprep.subr.bf16.mxu0 %v1323_v0  ;;  %s1329_s8 = smov 92   ;;  %s1330_s13 = smov 84  }
  0x78   : > { %s1331_s12 = smov 76   ;;  %s1332_s16 = smov 68  }
  0x79   : > { %s1333_s19 = smov 16   ;;  %s1334_s18 = smov 8  }
  0x7a   : > { %956 = vmatpush3.bf16.msra.mxu0 %v1083_v2  ;;  %s1335_s9 = smov 32   ;;  %s1336_s15 = smov 24  }
  0x7b   : > { %p1857_p2 = scmp.ne.s32.totalorder %s1851_s10, 0 }
  0x7d   : > { %958 = vmatmul.mubr.msk.bf16.vlgmr.msra.gmra.mrb[0].mxu0 %vm376_vm1, %v359_v4 }
 0x150   : > { %v1582_v6 = vpop.f32.mrb[0].mxu0 }
 0x151   : > { %535 = vrot.lane.b32.xlu1 %v1582_v6, %s1325_s29  ;;  %477 = vrot.lane.b32.xlu0 %v1582_v6, %s1326_s7  ;;  %v959_v7 = vpop.f32.mrb[1].mxu0  ;;  %v1588_v8 = vmul.f32 %v420_v5, %v1582_v6  ;;  %v1591_v11 = vsub.f32 0.0, %v1582_v6  ;;  %v1640_v41 = vpack.c.bf16 %v1582_v6, %v1582_v6 }
 0x152   : > { %v417_v9 = vpop.f32.mrb[2].mxu0 }
 0x153   : > { %v960_v10 = vpop.f32.mrb[3].mxu0 }
 0x155   : > { %593 = vrot.lane.b32.xlu1 %v1582_v6, %s1327_s20  ;;  %474 = vrot.lane.b32.xlu0 %v1591_v11, %s1325_s29  ;;  %s1337_s29 = smov 48  }
 0x159   : > { %443 = vrot.lane.b32.xlu1 %v1582_v6, %s1328_s28  ;;  %590 = vrot.lane.b32.xlu0 %v1591_v11, %s1328_s28  ;;  %s1339_s28 = smov 56  }
 0x15d   : > { %504 = vrot.lane.b32.xlu1 %v1582_v6, %s1329_s8  ;;  %440 = vrot.lane.b32.xlu0 %v1591_v11, %s1329_s8  ;;  %s1347_s8 = smov 112  }
 0x161   : > { %562 = vrot.lane.b32.xlu1 %v1582_v6, %s1330_s13  ;;  %501 = vrot.lane.b32.xlu0 %v1591_v11, %s1330_s13  ;;  %s1348_s13 = smov 104  }
 0x165   : > { %532 = vrot.lane.b32.xlu1 %v1591_v11, %s1327_s20  ;;  %559 = vrot.lane.b32.xlu0 %v1591_v11, %s1331_s12  ;;  %s1338_s20 = smov 40  }
 0x169   : > { %620 = vrot.lane.b32.xlu1 %v1582_v6, %s1331_s12  ;;  %617 = vrot.lane.b32.xlu0 %v1591_v11, %s1332_s16  ;;  %s1841_s12 = smov 4   ;;  %s1839_s16 = smov 64  }
 0x16d   : > { %539 = vrot.lane.b32.xlu1 %v420_v5, %s1333_s19  ;;  %481 = vrot.lane.b32.xlu0 %v420_v5, %s1334_s18 }
 0x171   : > { %448 = vrot.lane.b32.xlu1 %v420_v5, %s1335_s9  ;;  %597 = vrot.lane.b32.xlu0 %v420_v5, %s1336_s15 }
 0x175   : > { %566 = vrot.lane.b32.xlu1 %v420_v5, %s1337_s29  ;;  %508 = vrot.lane.b32.xlu0 %v420_v5, %s1338_s20 }
 0x179   : > { %624 = vrot.lane.b32.xlu0 %v420_v5, %s1339_s28 }
 0x1c3   : > { %v536_v12 = vpop.permute.xlu1 %535  ;;  %v478_v13 = vpop.permute.xlu0 %477 }
 0x1c7   : > { %v594_v15 = vpop.permute.xlu1 %593  ;;  %v475_v16 = vpop.permute.xlu0 %474 }
 0x1c8   : > { %v480_v17 = vsel %vm431_vm2, %v475_v16, %v478_v13 }
 0x1c9   : > { %v485_v18 = vmul.f32 %v480_v17, %v1613_v14 }
 0x1cb   : > { %v444_v19 = vpop.permute.xlu1 %443  ;;  %487 = vrot.lane.b32.xlu1 %v485_v18, %s1334_s18  ;;  %v591_v20 = vpop.permute.xlu0 %590  ;;  %s1344_s18 = smov 96  }
 0x1cc   : > { %v596_v21 = vsel %vm431_vm2, %v591_v20, %v594_v15 }
 0x1cd   : > { %v601_v22 = vmul.f32 %v596_v21, %v1613_v14 }
 0x1cf   : > { %v505_v23 = vpop.permute.xlu1 %504  ;;  %603 = vrot.lane.b32.xlu1 %v601_v22, %s1336_s15  ;;  %v441_v24 = vpop.permute.xlu0 %440  ;;  %s1345_s15 = smov 120  }
 0x1d0   : > { %v446_v33 = vsel %vm431_vm2, %v441_v24, %v444_v19 }
 0x1d1   : > { %v452_v37 = vmul.f32 %v446_v33, %v1613_v14 }
 0x1d3   : > { %v563_v25 = vpop.permute.xlu1 %562  ;;  %v502_v26 = vpop.permute.xlu0 %501 }
 0x1d4   : > { %v507_v27 = vsel %vm431_vm2, %v502_v26, %v505_v23 }
 0x1d5   : > { %v512_v28 = vmul.f32 %v507_v27, %v1613_v14 }
 0x1d7   : > { %v533_v29 = vpop.permute.xlu1 %532  ;;  %514 = vrot.lane.b32.xlu1 %v512_v28, %s1338_s20  ;;  %v560_v30 = vpop.permute.xlu0 %559 }
 0x1d8   : > { %v538_v31 = vsel %vm431_vm2, %v533_v29, %v536_v12  ;;  %v565_v39 = vsel %vm431_vm2, %v560_v30, %v563_v25 }
 0x1d9   : > { %v543_v32 = vmul.f32 %v538_v31, %v1613_v14  ;;  %v570_v40 = vmul.f32 %v565_v39, %v1613_v14 }
 0x1db   : > { %v621_v34 = vpop.permute.xlu1 %620  ;;  %545 = vrot.lane.b32.xlu0 %v543_v32, %s1333_s19  ;;  %v618_v35 = vpop.permute.xlu0 %617  ;;  %s1343_s19 = smov 72  }
 0x1dc   : > { %v623_v36 = vsel %vm431_vm2, %v618_v35, %v621_v34 }
 0x1dd   : > { %v628_v38 = vmul.f32 %v623_v36, %v1613_v14 }
 0x1df   : > { %454 = vrot.lane.b32.xlu0 %v452_v37, %s1335_s9  ;;  %630 = vrot.lane.b32.xlu1 %v628_v38, %s1339_s28  ;;  %v540_v42 = vpop.permute.xlu1 %539  ;;  %v482_v44 = vpop.permute.xlu0 %481  ;;  %s1656_s9 = sshll.u32 %s1570_s14, 4 }
 0x1e0   : > { %v484_v56 = vmul.f32 %v482_v44, %v1582_v6  ;;  %v542_v62 = vmul.f32 %v540_v42, %v1582_v6 }
 0x1e3   : > { %572 = vrot.lane.b32.xlu0 %v570_v40, %s1337_s29  ;;  %428 = vrot.lane.b32.xlu1 %v1582_v6, %s1841_s12  ;;  %v449_v43 = vpop.permute.xlu1 %448  ;;  %v598_v46 = vpop.permute.xlu0 %597 }
 0x1e4   : > { %v451_v57 = vmul.f32 %v449_v43, %v1582_v6  ;;  %v600_v9 = vmul.f32 %v598_v46, %v1582_v6 }
 0x1e7   : > { %424 = vrot.lane.b32.xlu0 %v1591_v11, %s1326_s7  ;;  %v567_v45 = vpop.permute.xlu1 %566  ;;  %v509_v48 = vpop.permute.xlu0 %508  ;;  %s1342_s7 = smov 88  }
 0x1e8   : > { %v511_v50 = vmul.f32 %v509_v48, %v1582_v6  ;;  %v569_v1 = vmul.f32 %v567_v45, %v1582_v6 }
 0x1eb   : > { %470 = vrot.lane.b32.xlu0 %v1640_v41, %s1839_s16  ;;  %v625_v51 = vpop.permute.xlu0 %624 }
 0x1ec   : > { %v627_v58 = vmul.f32 %v625_v51, %v1582_v6 }
 0x1ef   : > { %527 = vrot.lane.b32.xlu0 %v1640_v41, %s1339_s28  ;;  %s1662_s28 = scalar_lea.vmem [#allocation11], %s1656_s9 }
 0x1f3   : > { %585 = vrot.lane.b32.xlu0 %v1640_v41, %s1337_s29  ;;  %s1346_s29 = smov 80  }
 0x23d   : > { %v488_v47 = vpop.permute.xlu1 %487 }
 0x23e   : > { %v490_v59 = vadd.f32 %v488_v47, %v484_v56 }
 0x240   : > { %v491_v2 = vmul.f32 0.35355338, %v490_v59 }
 0x241   : > { %v604_v49 = vpop.permute.xlu1 %603 }
 0x242   : > { %v941_v11 = vpack.c.bf16 %v491_v2, %v491_v2  ;;  %v606_v12 = vadd.f32 %v604_v49, %v600_v9 }
 0x244   : > { %v607_v19 = vmul.f32 0.35355338, %v606_v12 }
 0x246   : > { %v945_v23 = vpack.c.bf16 %v607_v19, %v607_v19 }
 0x249   : > { %v515_v52 = vpop.permute.xlu1 %514 }
 0x24a   : > { %v517_v53 = vadd.f32 %v515_v52, %v511_v50 }
 0x24c   : > { %v942_v54 = vpack.c.bf16 %v517_v53, %v517_v53 }
 0x24d   : > { %v546_v55 = vpop.permute.xlu0 %545 }
 0x24e   : > { %522 = vrot.lane.b32.xlu1 %v942_v54, %s1342_s7  ;;  %v548_v3 = vadd.f32 %v546_v55, %v542_v62  ;;  %s1671_s7 = scalar_lea.vmem [#allocation8], %s1656_s9 }
 0x250   : > { %v549_v13 = vmul.f32 0.35355338, %v548_v3 }
 0x251   : > { %v631_v60 = vpop.permute.xlu1 %630  ;;  %v455_v61 = vpop.permute.xlu0 %454 }
 0x252   : > { %v633_v63 = vadd.f32 %v631_v60, %v627_v58  ;;  %v457_v0 = vadd.f32 %v455_v61, %v451_v57  ;;  %v943_v20 = vpack.c.bf16 %v549_v13, %v549_v13 }
 0x254   : > { %v946_v4 = vpack.c.bf16 %v633_v63, %v633_v63  ;;  %v939_v5 = vpack.c.bf16 %v457_v0, %v457_v0 }
 0x255   : > { %v573_v7 = vpop.permute.xlu0 %572  ;;  %v429_v16 = vpop.permute.xlu1 %428 }
 0x256   : > { %v575_v10 = vadd.f32 %v573_v7, %v569_v1  ;;  %638 = vrot.lane.b32.xlu1 %v946_v4, %s1343_s19  ;;  %462 = vrot.lane.b32.xlu0 %v939_v5, %s1344_s18  ;;  %s653_s18 = sand.u32 1, %s1418_s27  }
 0x257   : > { %s1698_s27 = scalar_lea.sflag [#allocation10], %s653_s18 }
 0x258   : > { %v944_v15 = vpack.c.bf16 %v575_v10, %v575_v10 }
 0x259   : > { %v425_v17 = vpop.permute.xlu0 %424 }
 0x25a   : > { %v432_v18 = vsel %vm431_vm2, %v425_v17, %v429_v16  ;;  %496 = vrot.lane.b32.xlu1 %v941_v11, %s1345_s15  ;;  %580 = vrot.lane.b32.xlu0 %v944_v15, %s1346_s29  ;;  %s1681_s15 = sshll.u32 %s1308_s24, 8  ;;  %s1349_s29 = smov [#allocation9]  }
 0x25b   : > { %v434_v6 = vmul.f32 %v432_v18, %v1613_v14 }
 0x25d   : > { %v435_v21 = vadd.f32 %v434_v6, %v1588_v8  ;;  %v471_v22 = vpop.permute.xlu0 %470 }
 0x25e   : > { %473 = vst.msk [vmem:[%s1662_s28] sm:$0xf] %vm438_vm3, %v471_v22  ;;  %554 = vrot.lane.b32.xlu1 %v943_v20, %s1347_s8  ;;  %643 = vrot.lane.b32.xlu0 %v1640_v41, %s1338_s20  ;;  %s345_s20 = scalar_lea.vmem [#allocation9], %s1656_s9  ;;  %s1691_s9 = scalar_lea.hbm %s1833_s5, %s1681_s15 }
 0x25f   : > { %v436_v14 = vmul.f32 0.35355338, %v435_v21  ;;  %s690_s19 = sshll.u32 %s345_s20, 4  ;;  %s1174_s8 = sshll.u32 %s1349_s29, 4  ;;  %s1685_s19 = int_to_ptr.vmem [resolvable:$true] %s690_s19  ;;  %s1175_s8 = int_to_ptr.vmem [resolvable:$false] %s1174_s8 }
 0x260   : > { %s1170_s16 = scalar_lea.vmem %s1685_s19, 256  ;;  %s1176_s12 = scalar_lea.vmem %s1175_s8, 512 }
 0x261   : > { %v437_v24 = vpack.c.bf16 %v436_v14, %v436_v14  ;;  %v528_v8 = vpop.permute.xlu0 %527  ;;  %p1171_p8 = scmp.ne.s32.totalorder %s1685_s19, %s1170_s16  ;;  %p1177_p7 = scmp.lt.s32.totalorder %s1685_s19, %s1175_s8 }
 0x262   : > { %917 = vst.msk [vmem:[%s1662_s28 + $0x4] sm:$0xf] %vm438_vm3, %v528_v8  ;;  %612 = vrot.lane.b32.xlu1 %v945_v23, %s1348_s13  ;;  %p1178_p12 = scmp.lt.s32.totalorder %s1176_s12, %s1170_s16 }
 0x263   : > { %439 = vst.msk [vmem:[%s1671_s7] sm:$0xf] %vm438_vm3, %v437_v24  ;;  %p1172_p13 = pnand %p1171_p8, %p1857_p2 }
 0x264   : > { %p1179_p0 = por %p1178_p12, %p1177_p7 }
 0x265   : > { %v586_v25 = vpop.permute.xlu0 %585  ;;  %p1173_p5 = pneg %p1172_p13 }
 0x266   : > { %922 = vst.msk [vmem:[%s1662_s28 + $0x8] sm:$0xf] %vm438_vm3, %v586_v25 }
 0x267   : > { %p1180_p1 = pnand %p1179_p0, %p1173_p5 }
 0x2c0   : > { %v523_v26 = vpop.permute.xlu1 %522 }
 0x2c1   : > { %916 = vst.msk [vmem:[%s345_s20 + $0x4] sm:$0xf] %vm438_vm3, %v523_v26 }
 0x2c8   : > { %v639_v27 = vpop.permute.xlu1 %638  ;;  %v463_v28 = vpop.permute.xlu0 %462 }
 0x2c9   : > { %926 = vst.msk [vmem:[%s345_s20 + $0xc] sm:$0xf] %vm438_vm3, %v639_v27  ;;  %465 = vst.msk [vmem:[%s345_s20] sm:$0xf] %vm438_vm3, %v463_v28 }
 0x2cc   : > { %v497_v29 = vpop.permute.xlu1 %496  ;;  %v581_v30 = vpop.permute.xlu0 %580 }
 0x2cd   : > { %914 = vst.msk [vmem:[%s1671_s7 + $0x4] sm:$0xf] %vm438_vm3, %v497_v29  ;;  %921 = vst.msk [vmem:[%s345_s20 + $0x8] sm:$0xf] %vm438_vm3, %v581_v30 }
 0x2ce   : > { %1183 = shalt.err (!%p1180_p1)
}
 0x2cf   : > { %s1184_s20 = scalar_lea.hbm %s1691_s9, 256  ;;  %s1188_s29 = scalar_lea.hbm %s1833_s5, 512 }
 0x2d0   : > { %p1185_p6 = scmp.ne.s32.totalorder %s1691_s9, %s1184_s20  ;;  %p1189_p4 = scmp.lt.u32.totalorder %s1691_s9, %s1833_s5 }
 0x2d1   : > { %p1190_p9 = scmp.lt.u32.totalorder %s1188_s29, %s1184_s20  ;;  %p1192_p8 = scmp.lt.u32.totalorder %s1184_s20, %s1691_s9 }
 0x2d2   : > { %p1186_p10 = pnand %p1185_p6, %p1857_p2 }
 0x2d3   : > { %p1191_p11 = por %p1190_p9, %p1189_p4 }
 0x2d4   : > { %p1187_p3 = pneg %p1186_p10 }
 0x2d5   : > { %p1193_p13 = por %p1192_p8, %p1191_p11 }
 0x2d7   : > { %p1194_p5 = pnand %p1193_p13, %p1187_p3 }
 0x2d9   : > { %1197 = shalt.err (!%p1194_p5)
}
 0x2da   : > { %s1858_s12 = smov 4   ;;  %s1859_s16 = smov 64   ;;  %v555_v31 = vpop.permute.xlu1 %554  ;;  %v644_v32 = vpop.permute.xlu0 %643 }
 0x2db   : > { %972 = dma.vmem_to_hbm [thread:$0]  (%p1857_p2), %s1685_s19, 256, %s1691_s9, %s1698_s27, %s1859_s16, %s1859_s16, %s1858_s12  }
 0x2dc   : > { %s1860_s13 = sshll.u32 %s1662_s28, 4  ;;  %s1733_s18 = scalar_lea.hbm %s1834_s6, %s1681_s15  ;;  %919 = vst.msk [vmem:[%s1671_s7 + $0x8] sm:$0xf] %vm438_vm3, %v555_v31  ;;  %927 = vst.msk [vmem:[%s1662_s28 + $0xc] sm:$0xf] %vm438_vm3, %v644_v32  ;;  %s1727_s13 = int_to_ptr.vmem [resolvable:$true] %s1860_s13 }
 0x2dd   : > { %s1861_s29 = sshll.u32 %s1671_s7, 4  ;;  %s1198_s19 = scalar_lea.vmem %s1727_s13, 256  ;;  %s1737_s29 = int_to_ptr.vmem [resolvable:$true] %s1861_s29 }
 0x2de   : > { %p1199_p7 = scmp.ne.s32.totalorder %s1727_s13, %s1198_s19  ;;  %s1350_s9 = smov [#allocation11]  }
 0x2df   : > { %s1202_s8 = sshll.u32 %s1350_s9, 4  ;;  %s1203_s8 = int_to_ptr.vmem [resolvable:$false] %s1202_s8 }
 0x2e0   : > { %p1200_p12 = pnand %p1199_p7, %p1857_p2  ;;  %s1204_s24 = scalar_lea.vmem %s1203_s8, 512 }
 0x2e1   : > { %p1205_p1 = scmp.lt.s32.totalorder %s1727_s13, %s1203_s8  ;;  %p1206_p6 = scmp.lt.s32.totalorder %s1204_s24, %s1198_s19 }
 0x2e2   : > { %p1201_p0 = pneg %p1200_p12 }
 0x2e3   : > { %p1207_p10 = por %p1206_p6, %p1205_p1 }
 0x2e5   : > { %p1208_p3 = pnand %p1207_p10, %p1201_p0 }
 0x2e7   : > { %1211 = shalt.err (!%p1208_p3)
}
 0x2e8   : > { %s1212_s28 = scalar_lea.hbm %s1733_s18, 256  ;;  %s1216_s9 = scalar_lea.hbm %s1834_s6, 512 }
 0x2e9   : > { %p1213_p4 = scmp.ne.s32.totalorder %s1733_s18, %s1212_s28  ;;  %p1217_p8 = scmp.lt.u32.totalorder %s1733_s18, %s1834_s6 }
 0x2ea   : > { %p1218_p13 = scmp.lt.u32.totalorder %s1216_s9, %s1212_s28  ;;  %p1220_p7 = scmp.lt.u32.totalorder %s1212_s28, %s1733_s18 }
 0x2eb   : > { %p1214_p9 = pnand %p1213_p4, %p1857_p2 }
 0x2ec   : > { %p1219_p5 = por %p1218_p13, %p1217_p8 }
 0x2ed   : > { %p1215_p11 = pneg %p1214_p9 }
 0x2ee   : > { %p1221_p12 = por %p1220_p7, %p1219_p5 }
 0x2f0   : > { %p1222_p0 = pnand %p1221_p12, %p1215_p11 }
 0x2f2   : > { %1225 = shalt.err (!%p1222_p0)
}
 0x2f3   : > { %973 = dma.vmem_to_hbm [thread:$0]  (%p1857_p2), %s1727_s13, 256, %s1733_s18, %s1698_s27, %s1859_s16, %s1859_s16, %s1858_s12   ;;  %v613_v33 = vpop.permute.xlu1 %612 }
 0x2f4   : > { %s1772_s19 = scalar_lea.hbm %s1832_s4, %s1681_s15  ;;  %924 = vst.msk [vmem:[%s1671_s7 + $0xc] sm:$0xf] %vm438_vm3, %v613_v33  ;;  %s649_s24 = scalar_lea.sflag [#allocation4], %s1570_s14 }
 0x2f5   : > { %s1226_s28 = scalar_lea.vmem %s1737_s29, 256  ;;  %s1351_s20 = smov [#allocation8]  }
 0x2f6   : > { %p1227_p1 = scmp.ne.s32.totalorder %s1737_s29, %s1226_s28  ;;  %s1230_s9 = sshll.u32 %s1351_s20, 4  ;;  %s1231_s9 = int_to_ptr.vmem [resolvable:$false] %s1230_s9 }
 0x2f7   : > { %s1232_s8 = scalar_lea.vmem %s1231_s9, 512  ;;  %p1233_p3 = scmp.lt.s32.totalorder %s1737_s29, %s1231_s9 }
 0x2f8   : > { %p1228_p6 = pnand %p1227_p1, %p1857_p2  ;;  %p1234_p4 = scmp.lt.s32.totalorder %s1232_s8, %s1226_s28 }
 0x2fa   : > { %p1229_p10 = pneg %p1228_p6  ;;  %p1235_p9 = por %p1234_p4, %p1233_p3 }
 0x2fc   : > { %p1236_p11 = pnand %p1235_p9, %p1229_p10 }
 0x2fe   : > { %1239 = shalt.err (!%p1236_p11)
}
 0x2ff   : > { %s1240_s7 = scalar_lea.hbm %s1772_s19, 256  ;;  %s1244_s13 = scalar_lea.hbm %s1832_s4, 512 }
 0x300   : > { %p1241_p8 = scmp.ne.s32.totalorder %s1772_s19, %s1240_s7  ;;  %p1245_p7 = scmp.lt.u32.totalorder %s1772_s19, %s1832_s4 }
 0x301   : > { %p1246_p12 = scmp.lt.u32.totalorder %s1244_s13, %s1240_s7  ;;  %p1248_p1 = scmp.lt.u32.totalorder %s1240_s7, %s1772_s19 }
 0x302   : > { %p1242_p13 = pnand %p1241_p8, %p1857_p2 }
 0x303   : > { %p1247_p0 = por %p1246_p12, %p1245_p7 }
 0x304   : > { %p1243_p5 = pneg %p1242_p13 }
 0x305   : > { %p1249_p6 = por %p1248_p1, %p1247_p0 }
 0x307   : > { %p1250_p10 = pnand %p1249_p6, %p1243_p5 }
 0x309   : > { %1253 = shalt.err (!%p1250_p10)
}
 0x30a   : > { %971 = dma.vmem_to_hbm [thread:$0]  (%p1857_p2), %s1737_s29, 256, %s1772_s19, %s649_s24, %s1859_s16, %s1859_s16, %s1858_s12  }
 0x30b PF: > { %s722_s1 = sand.u32 1, %s1296_s21   ;;  %p1862_p3 = scmp.ne.s32.totalorder %s1846_s30, 0 }
 0x30c   : > { %p1863_p4 = scmp.ge.s32.totalorder %s1316_s26, 2  ;;  %s723_s28 = scalar_lea.sflag [#allocation4], %s722_s1 }
 0x30e   : > { %p989_p9 = pnand %p1863_p4, %p1862_p3 }
 0x310   : > { %1287 = dma.done.wait (!%p989_p9), %s723_s28, 256  }
 0x311   : > { %1289 = vsyncadd (!%p989_p9), %s723_s28, 4294967040  ;;  %s1864_s10 = sadd.s32 4294967294, %s1316_s26  }
 0x312   : > { %s731_s20 = sand.u32 1, %s1864_s10  }
 0x313   : > { %s732_s9 = scalar_lea.sflag [#allocation10], %s731_s20 }
 0x314   : > { %1291 = dma.done.wait (!%p989_p9), %s732_s9, 512  }
 0x315   : > { %1293 = vsyncadd (!%p989_p9), %s732_s9, 4294966784  ;;  %s27_s26 = sadd.s32 1, %s1316_s26   ;;  %s1865_s21 = smov %s1300_s22 }
 0x316   : > { %p24_p2 = scmp.ge.s32.totalorder %s27_s26, 4   ;;  %s1866_s22 = smov %s1304_s23 }
 0x317   : > { %s1867_s23 = smov %s1527_s17  ;;  %s1868_s24 = smov %s1312_s25 }
 0x318   : > { %s1869_s25 = smov %s1871_s11  ;;  %26 = sbr.rel (!%p24_p2) target bundleno = 12 (0xc), region = 134 }
 0x31f   :  { %746 = vsyncpa [#allocation3], 1 }
 0x320   :  { %748 = vsyncpa [#allocation3 + $0x1], 1 }
 0x321   :  { %749 = vsyncpa [#allocation6], 1 }
 0x322   :  { %750 = vsyncpa [#allocation4], 1 }
 0x323   :  { %752 = vsyncpa [#allocation4 + $0x1], 1 }
 0x324   :  { %753 = vsyncpa [#allocation10], 1 }
 0x325   :  { %755 = vsyncpa [#allocation10 + $0x1], 1 }

</bundles_post_ra>
